<compile_context>
chip_gen: v7x
topology: tpu7x:2x2x1
jax: 0.10.0
libtpu: 0.0.40
codegen_flags: <defaults>
</compile_context>

<pallas_src>
import functools

import jax
import jax.numpy as jnp
from jax.experimental import pallas as pl
from jax.experimental.pallas import tpu as pltpu


def _spatial_attn_kernel(kernel_size, x_ref, w_ref, out_ref, attn_ref):
    # x_ref:    (NB, C, Lp) input tile
    # w_ref:    (2, K) conv weights in SMEM (scalar reads per tap)
    # out_ref:  (NB, C, Lp) attn * x
    # attn_ref: (NB, Lp)    attention map (sublane/lane dense)
    K = kernel_size
    pad = (K - 1) // 2

    # Channel reductions in f32 (upcast only for the reduction; the upcast
    # tile's live range ends right here -- we re-read x_ref for the multiply).
    xf = x_ref[...].astype(jnp.float32)            # (NB, C, Lp)
    avg = jnp.mean(xf, axis=1)                     # (NB, Lp)
    mx = jnp.max(xf, axis=1)                       # (NB, Lp)

    nb, lp = avg.shape
    zeros = jnp.zeros((nb, pad), jnp.float32)
    avg_p = jnp.concatenate([zeros, avg, zeros], axis=1)   # (NB, Lp + 2*pad)
    mx_p = jnp.concatenate([zeros, mx, zeros], axis=1)     # (NB, Lp + 2*pad)

    # Cross-correlation (PyTorch conv) as K shifted weighted adds, f32 accum.
    acc = jnp.zeros((nb, lp), jnp.float32)
    for k in range(K):
        w_avg = w_ref[0, k]                        # scalar from SMEM
        w_max = w_ref[1, k]
        acc = acc + w_avg * avg_p[:, k:k + lp] + w_max * mx_p[:, k:k + lp]

    attn = jax.nn.sigmoid(acc)                     # (NB, Lp) f32
    attn_ref[...] = attn.astype(attn_ref.dtype)

    # Re-read the pipelined VMEM input buffer instead of keeping xf alive.
    attn_o = attn.astype(out_ref.dtype)[:, None, :]        # (NB, 1, Lp)
    out_ref[...] = attn_o * x_ref[...]                     # broadcast over C


def spatial_attention_1d(x, w, *, kernel_size=7, target_block_bytes=2 << 20):
    """x: (N, C, L); w: (2, kernel_size). Returns (attn * x, attn[N,1,L])."""
    N, C, L = x.shape
    K = kernel_size
    assert w.shape == (2, K)

    # Lane-dense spatial axis (multiple of 128).
    Lp = ((L + 127) // 128) * 128
    itemsize = jnp.dtype(x.dtype).itemsize

    # Batch elements per grid step: ~target_block_bytes per input tile,
    # multiple of 8 (sublane-dense attn tile), capped near the batch size so
    # we don't over-pad tiny batches.
    nb = int(max(1, target_block_bytes // (C * Lp * itemsize)))
    nb = max(8, (nb // 8) * 8)
    n_ceil8 = ((N + 7) // 8) * 8
    nb = min(nb, n_ceil8)

    Np = ((N + nb - 1) // nb) * nb

    if (Np, Lp) != (N, L):
        # Zero padding is equivalent to Conv1d's own zero padding along L and
        # produces discarded rows along N; sliced off below.
        x_in = jnp.pad(x, ((0, Np - N), (0, 0), (0, Lp - L)))
    else:
        x_in = x

    grid = (Np // nb,)
    kernel = functools.partial(_spatial_attn_kernel, kernel_size)

    out_p, attn_p = pl.pallas_call(
        kernel,
        grid=grid,
        in_specs=[
            pl.BlockSpec((nb, C, Lp), lambda n: (n, 0, 0)),        # x tile
            pl.BlockSpec(memory_space=pltpu.MemorySpace.SMEM),     # conv weights
        ],
        out_specs=[
            pl.BlockSpec((nb, C, Lp), lambda n: (n, 0, 0)),        # attn * x
            pl.BlockSpec((nb, Lp), lambda n: (n, 0)),              # attn map
        ],
        out_shape=(
            jax.ShapeDtypeStruct((Np, C, Lp), x.dtype),
            jax.ShapeDtypeStruct((Np, Lp), x.dtype),
        ),
        compiler_params=pltpu.CompilerParams(
            dimension_semantics=("parallel",),
            vmem_limit_bytes=48 * 1024 * 1024,
        ),
    )(x_in, w)

    out = out_p[:N, :, :L]
    attn = attn_p[:N, :L][:, None, :]              # (N, 1, L) like the module
    return out, attn


def _reference(x, w, kernel_size=7):
    # Plain-JAX reference for verification.
    pad = (kernel_size - 1) // 2
    avg = jnp.mean(x, axis=1, keepdims=True)
    mx = jnp.max(x, axis=1, keepdims=True)
    cat = jnp.concatenate([avg, mx], axis=1)                  # (N, 2, L)
    conv = jax.lax.conv_general_dilated(
        cat, w[None, :, :],                                   # (O=1, I=2, K)
        window_strides=(1,), padding=[(pad, pad)],
        dimension_numbers=("NCH", "OIH", "NCH"))
    attn = jax.nn.sigmoid(conv)                               # (N, 1, L)
    return attn * x, attn


if __name__ == "__main__":
    key = jax.random.PRNGKey(0)

    # Test 1: kernel_size=7, unaligned L, batch smaller than the block.
    k1, k2, k3, k4 = jax.random.split(key, 4)
    N, C, L, K = 2, 4, 16, 7
    x = jax.random.normal(k1, (N, C, L), dtype=jnp.float32)
    w = 0.1 * jax.random.normal(k2, (2, K), dtype=jnp.float32)

    out, attn = spatial_attention_1d(x, w, kernel_size=K)
    jax.block_until_ready(out)
    jax.block_until_ready(attn)
    ref_out, ref_attn = _reference(x, w, K)
    assert jnp.allclose(out, ref_out, atol=1e-5, rtol=1e-5)
    assert jnp.allclose(attn, ref_attn, atol=1e-5, rtol=1e-5)

    # Test 2: kernel_size=3, L already 128-aligned.
    N2, C2, L2, K2 = 3, 5, 128, 3
    x2 = jax.random.normal(k3, (N2, C2, L2), dtype=jnp.float32)
    w2 = 0.1 * jax.random.normal(k4, (2, K2), dtype=jnp.float32)

    out2, attn2 = spatial_attention_1d(x2, w2, kernel_size=K2)
    jax.block_until_ready(out2)
    jax.block_until_ready(attn2)
    ref_out2, ref_attn2 = _reference(x2, w2, K2)
    assert jnp.allclose(out2, ref_out2, atol=1e-5, rtol=1e-5)
    assert jnp.allclose(attn2, ref_attn2, atol=1e-5, rtol=1e-5)

    print("KERNEL_OK")
</pallas_src>

<mosaic_0001>
module attributes {stable_mosaic.version = 11 : i64} {
  func.func @_spatial_attn_kernel(%arg0: i32, %arg1: memref<8x4x128xf32, #tpu.memory_space<vmem>>, %arg2: memref<2x7xf32, #tpu.memory_space<smem>>, %arg3: memref<8x4x128xf32, #tpu.memory_space<vmem>>, %arg4: memref<8x128xf32, #tpu.memory_space<vmem>>) attributes {dimension_semantics = [#tpu.dimension_semantics<parallel>], iteration_bounds = array<i64: 1>, scalar_prefetch = 0 : i64, scratch_operands = 0 : i64, tpu.core_type = #tpu.core_type<tc>, window_params = [{transform_indices = @transform_0, window_bounds = array<i64: 8, 4, 128>}, {transform_indices = @transform_1, window_bounds = array<i64: 2, 7>}, {transform_indices = @transform_2, window_bounds = array<i64: 8, 4, 128>}, {transform_indices = @transform_3, window_bounds = array<i64: 8, 128>}]} {
    %c0 = arith.constant 0 : index
    %c0_0 = arith.constant 0 : index
    %c0_1 = arith.constant 0 : index
    %0 = vector.load %arg1[%c0, %c0_0, %c0_1] : memref<8x4x128xf32, #tpu.memory_space<vmem>>, vector<8x4x128xf32>
    %cst = arith.constant dense<0.000000e+00> : vector<8x128xf32>
    %1 = vector.multi_reduction <add>, %0, %cst [1] : vector<8x4x128xf32> to vector<8x128xf32>
    %cst_2 = arith.constant 4.000000e+00 : f32
    %2 = vector.broadcast %cst_2 : f32 to vector<8x128xf32>
    %3 = arith.divf %1, %2 : vector<8x128xf32>
    %cst_3 = arith.constant dense<0xFF800000> : vector<8x128xf32>
    %4 = vector.multi_reduction <maximumf>, %0, %cst_3 [1] : vector<8x4x128xf32> to vector<8x128xf32>
    %cst_4 = arith.constant 0.000000e+00 : f32
    %5 = vector.broadcast %cst_4 : f32 to vector<8x3xf32>
    %6 = tpu.concatenate %5, %3, %5 in 1 : vector<8x3xf32>, vector<8x128xf32>, vector<8x3xf32> -> vector<8x134xf32>
    %7 = tpu.concatenate %5, %4, %5 in 1 : vector<8x3xf32>, vector<8x128xf32>, vector<8x3xf32> -> vector<8x134xf32>
    %cst_5 = arith.constant 0.000000e+00 : f32
    %8 = vector.broadcast %cst_5 : f32 to vector<8x128xf32>
    %c0_6 = arith.constant 0 : index
    %c0_7 = arith.constant 0 : index
    %9 = memref.load %arg2[%c0_6, %c0_7] : memref<2x7xf32, #tpu.memory_space<smem>>
    %c1 = arith.constant 1 : index
    %c0_8 = arith.constant 0 : index
    %10 = memref.load %arg2[%c1, %c0_8] : memref<2x7xf32, #tpu.memory_space<smem>>
    %11 = vector.extract_strided_slice %6 {offsets = [0, 0], sizes = [8, 128], strides = [1, 1]} : vector<8x134xf32> to vector<8x128xf32>
    %12 = vector.broadcast %9 : f32 to vector<8x128xf32>
    %13 = arith.mulf %12, %11 : vector<8x128xf32>
    %14 = arith.addf %8, %13 : vector<8x128xf32>
    %15 = vector.extract_strided_slice %7 {offsets = [0, 0], sizes = [8, 128], strides = [1, 1]} : vector<8x134xf32> to vector<8x128xf32>
    %16 = vector.broadcast %10 : f32 to vector<8x128xf32>
    %17 = arith.mulf %16, %15 : vector<8x128xf32>
    %18 = arith.addf %14, %17 : vector<8x128xf32>
    %c0_9 = arith.constant 0 : index
    %c1_10 = arith.constant 1 : index
    %19 = memref.load %arg2[%c0_9, %c1_10] : memref<2x7xf32, #tpu.memory_space<smem>>
    %c1_11 = arith.constant 1 : index
    %c1_12 = arith.constant 1 : index
    %20 = memref.load %arg2[%c1_11, %c1_12] : memref<2x7xf32, #tpu.memory_space<smem>>
    %21 = vector.extract_strided_slice %6 {offsets = [0, 1], sizes = [8, 128], strides = [1, 1]} : vector<8x134xf32> to vector<8x128xf32>
    %22 = vector.broadcast %19 : f32 to vector<8x128xf32>
    %23 = arith.mulf %22, %21 : vector<8x128xf32>
    %24 = arith.addf %18, %23 : vector<8x128xf32>
    %25 = vector.extract_strided_slice %7 {offsets = [0, 1], sizes = [8, 128], strides = [1, 1]} : vector<8x134xf32> to vector<8x128xf32>
    %26 = vector.broadcast %20 : f32 to vector<8x128xf32>
    %27 = arith.mulf %26, %25 : vector<8x128xf32>
    %28 = arith.addf %24, %27 : vector<8x128xf32>
    %c0_13 = arith.constant 0 : index
    %c2 = arith.constant 2 : index
    %29 = memref.load %arg2[%c0_13, %c2] : memref<2x7xf32, #tpu.memory_space<smem>>
    %c1_14 = arith.constant 1 : index
    %c2_15 = arith.constant 2 : index
    %30 = memref.load %arg2[%c1_14, %c2_15] : memref<2x7xf32, #tpu.memory_space<smem>>
    %31 = vector.extract_strided_slice %6 {offsets = [0, 2], sizes = [8, 128], strides = [1, 1]} : vector<8x134xf32> to vector<8x128xf32>
    %32 = vector.broadcast %29 : f32 to vector<8x128xf32>
    %33 = arith.mulf %32, %31 : vector<8x128xf32>
    %34 = arith.addf %28, %33 : vector<8x128xf32>
    %35 = vector.extract_strided_slice %7 {offsets = [0, 2], sizes = [8, 128], strides = [1, 1]} : vector<8x134xf32> to vector<8x128xf32>
    %36 = vector.broadcast %30 : f32 to vector<8x128xf32>
    %37 = arith.mulf %36, %35 : vector<8x128xf32>
    %38 = arith.addf %34, %37 : vector<8x128xf32>
    %c0_16 = arith.constant 0 : index
    %c3 = arith.constant 3 : index
    %39 = memref.load %arg2[%c0_16, %c3] : memref<2x7xf32, #tpu.memory_space<smem>>
    %c1_17 = arith.constant 1 : index
    %c3_18 = arith.constant 3 : index
    %40 = memref.load %arg2[%c1_17, %c3_18] : memref<2x7xf32, #tpu.memory_space<smem>>
    %41 = vector.extract_strided_slice %6 {offsets = [0, 3], sizes = [8, 128], strides = [1, 1]} : vector<8x134xf32> to vector<8x128xf32>
    %42 = vector.broadcast %39 : f32 to vector<8x128xf32>
    %43 = arith.mulf %42, %41 : vector<8x128xf32>
    %44 = arith.addf %38, %43 : vector<8x128xf32>
    %45 = vector.extract_strided_slice %7 {offsets = [0, 3], sizes = [8, 128], strides = [1, 1]} : vector<8x134xf32> to vector<8x128xf32>
    %46 = vector.broadcast %40 : f32 to vector<8x128xf32>
    %47 = arith.mulf %46, %45 : vector<8x128xf32>
    %48 = arith.addf %44, %47 : vector<8x128xf32>
    %c0_19 = arith.constant 0 : index
    %c4 = arith.constant 4 : index
    %49 = memref.load %arg2[%c0_19, %c4] : memref<2x7xf32, #tpu.memory_space<smem>>
    %c1_20 = arith.constant 1 : index
    %c4_21 = arith.constant 4 : index
    %50 = memref.load %arg2[%c1_20, %c4_21] : memref<2x7xf32, #tpu.memory_space<smem>>
    %51 = vector.extract_strided_slice %6 {offsets = [0, 4], sizes = [8, 128], strides = [1, 1]} : vector<8x134xf32> to vector<8x128xf32>
    %52 = vector.broadcast %49 : f32 to vector<8x128xf32>
    %53 = arith.mulf %52, %51 : vector<8x128xf32>
    %54 = arith.addf %48, %53 : vector<8x128xf32>
    %55 = vector.extract_strided_slice %7 {offsets = [0, 4], sizes = [8, 128], strides = [1, 1]} : vector<8x134xf32> to vector<8x128xf32>
    %56 = vector.broadcast %50 : f32 to vector<8x128xf32>
    %57 = arith.mulf %56, %55 : vector<8x128xf32>
    %58 = arith.addf %54, %57 : vector<8x128xf32>
    %c0_22 = arith.constant 0 : index
    %c5 = arith.constant 5 : index
    %59 = memref.load %arg2[%c0_22, %c5] : memref<2x7xf32, #tpu.memory_space<smem>>
    %c1_23 = arith.constant 1 : index
    %c5_24 = arith.constant 5 : index
    %60 = memref.load %arg2[%c1_23, %c5_24] : memref<2x7xf32, #tpu.memory_space<smem>>
    %61 = vector.extract_strided_slice %6 {offsets = [0, 5], sizes = [8, 128], strides = [1, 1]} : vector<8x134xf32> to vector<8x128xf32>
    %62 = vector.broadcast %59 : f32 to vector<8x128xf32>
    %63 = arith.mulf %62, %61 : vector<8x128xf32>
    %64 = arith.addf %58, %63 : vector<8x128xf32>
    %65 = vector.extract_strided_slice %7 {offsets = [0, 5], sizes = [8, 128], strides = [1, 1]} : vector<8x134xf32> to vector<8x128xf32>
    %66 = vector.broadcast %60 : f32 to vector<8x128xf32>
    %67 = arith.mulf %66, %65 : vector<8x128xf32>
    %68 = arith.addf %64, %67 : vector<8x128xf32>
    %c0_25 = arith.constant 0 : index
    %c6 = arith.constant 6 : index
    %69 = memref.load %arg2[%c0_25, %c6] : memref<2x7xf32, #tpu.memory_space<smem>>
    %c1_26 = arith.constant 1 : index
    %c6_27 = arith.constant 6 : index
    %70 = memref.load %arg2[%c1_26, %c6_27] : memref<2x7xf32, #tpu.memory_space<smem>>
    %71 = vector.extract_strided_slice %6 {offsets = [0, 6], sizes = [8, 128], strides = [1, 1]} : vector<8x134xf32> to vector<8x128xf32>
    %72 = vector.broadcast %69 : f32 to vector<8x128xf32>
    %73 = arith.mulf %72, %71 : vector<8x128xf32>
    %74 = arith.addf %68, %73 : vector<8x128xf32>
    %75 = vector.extract_strided_slice %7 {offsets = [0, 6], sizes = [8, 128], strides = [1, 1]} : vector<8x134xf32> to vector<8x128xf32>
    %76 = vector.broadcast %70 : f32 to vector<8x128xf32>
    %77 = arith.mulf %76, %75 : vector<8x128xf32>
    %78 = arith.addf %74, %77 : vector<8x128xf32>
    %79 = arith.negf %78 : vector<8x128xf32>
    %80 = math.exp %79 : vector<8x128xf32>
    %cst_28 = arith.constant 1.000000e+00 : f32
    %81 = vector.broadcast %cst_28 : f32 to vector<8x128xf32>
    %82 = arith.addf %81, %80 : vector<8x128xf32>
    %83 = arith.divf %81, %82 : vector<8x128xf32>
    %c0_29 = arith.constant 0 : index
    %c0_30 = arith.constant 0 : index
    %84 = vector.load %arg4[%c0_29, %c0_30] : memref<8x128xf32, #tpu.memory_space<vmem>>, vector<8x128xf32>
    tpu.vector_store %arg4[%c0_29, %c0_30], %83 {strides = array<i32>} : memref<8x128xf32, #tpu.memory_space<vmem>>, vector<8x128xf32>,
    %85 = vector.shape_cast %83 : vector<8x128xf32> to vector<8x1x128xf32>
    %c0_31 = arith.constant 0 : index
    %c0_32 = arith.constant 0 : index
    %c0_33 = arith.constant 0 : index
    %86 = vector.load %arg1[%c0_31, %c0_32, %c0_33] : memref<8x4x128xf32, #tpu.memory_space<vmem>>, vector<8x4x128xf32>
    %87 = vector.broadcast %85 : vector<8x1x128xf32> to vector<8x4x128xf32>
    %88 = arith.mulf %87, %86 : vector<8x4x128xf32>
    %c0_34 = arith.constant 0 : index
    %c0_35 = arith.constant 0 : index
    %c0_36 = arith.constant 0 : index
    %89 = vector.load %arg3[%c0_34, %c0_35, %c0_36] : memref<8x4x128xf32, #tpu.memory_space<vmem>>, vector<8x4x128xf32>
    tpu.vector_store %arg3[%c0_34, %c0_35, %c0_36], %88 {strides = array<i32>} : memref<8x4x128xf32, #tpu.memory_space<vmem>>, vector<8x4x128xf32>,
    return
  }
  func.func @transform_0(%arg0: i32) -> (i32, i32, i32) {
    %c0_i32 = arith.constant 0 : i32
    %c0_i32_0 = arith.constant 0 : i32
    %c0_i32_1 = arith.constant 0 : i32
    return %arg0, %c0_i32, %c0_i32_0 : i32, i32, i32
  }
  func.func @transform_1(%arg0: i32) -> (i32, i32) {
    %c0_i32 = arith.constant 0 : i32
    %c0_i32_0 = arith.constant 0 : i32
    %c0_i32_1 = arith.constant 0 : i32
    return %c0_i32, %c0_i32_0 : i32, i32
  }
  func.func @transform_2(%arg0: i32) -> (i32, i32, i32) {
    %c0_i32 = arith.constant 0 : i32
    %c0_i32_0 = arith.constant 0 : i32
    %c0_i32_1 = arith.constant 0 : i32
    return %arg0, %c0_i32, %c0_i32_0 : i32, i32, i32
  }
  func.func @transform_3(%arg0: i32) -> (i32, i32) {
    %c0_i32 = arith.constant 0 : i32
    %c0_i32_0 = arith.constant 0 : i32
    return %arg0, %c0_i32 : i32, i32
  }
}

</mosaic_0001>

<bundles_post_ra>
// kernel: tpu_custom_call.1
= control target key start
LH: loop header
LB: loop body
LE: loop exit
PB: predicated region body
PF: predicated region fallthrough
CT: control target
= control target key end

     0   :  { %9 = vsyncpa [#allocation3], 0  ;;  %s863_s0 = inlined_call_operand.hbm [shape: f32[8,4,128], index: 0, kind: input, shape index: {}]   ;;  %s864_s1 = inlined_call_operand.vmem [shape: f32[2,7], index: 1, kind: input, shape index: {}]   ;;  %s865_s2 = inlined_call_operand.hbm [shape: f32[8,4,128], index: 2, kind: output, shape index: {0}]   ;;  %s866_s3 = inlined_call_operand.hbm [shape: f32[8,128], index: 3, kind: output, shape index: {1}]  }
   0x1   :  { %10 = vsyncpa [#allocation5], 0 }
   0x2   :  { %11 = vsyncpa [#allocation4], 0 }
   0x3   :  { %12 = vsyncpa [#allocation9], 0  ;;  %s661_s12 = smov [#allocation2]   ;;  %s31_s16 = sshll.u32 %s864_s1, 4  ;;  %s32_s16 = int_to_ptr.vmem [resolvable:$true] %s31_s16 }
   0x4   :  { %s18_s13 = sshll.u32 %s661_s12, 4  ;;  %s575_s19 = scalar_lea.hbm %s863_s0, 512  ;;  %s19_s13 = int_to_ptr.vmem [resolvable:$true] %s18_s13 }
   0x5   :  { %p576_p0 = scmp.ne.s32.totalorder %s863_s0, %s575_s19  ;;  %p579_p1 = scmp.lt.u32.totalorder %s575_s19, %s863_s0 }
   0x7   :  { %p581_p2 = pnand %p579_p1, %p576_p0 }
   0x9   :  { %584 = shalt.err (!%p581_p2)
}
   0xa   :  { %s585_s24 = scalar_lea.vmem %s19_s13, 512  ;;  %p590_p4 = scmp.lt.s32.totalorder %s19_s13, %s19_s13 }
   0xb   :  { %p586_p3 = scmp.ne.s32.totalorder %s19_s13, %s585_s24  ;;  %p591_p5 = scmp.lt.s32.totalorder %s585_s24, %s585_s24 }
   0xd   :  { %p592_p6 = por %p591_p5, %p590_p4 }
   0xf   :  { %p593_p7 = pnand %p592_p6, %p586_p3 }
  0x11   :  { %596 = shalt.err (!%p593_p7)
}
  0x12   :  { %s662_s1 = smov 64   ;;  %s663_s25 = smov 4  }
  0x13   :  { %24 = dma.hbm_to_vmem [thread:$0]  %s863_s0, 512, %s19_s13, [#allocation3], %s662_s1, %s662_s1, %s663_s25  }
  0x14   :  { %s597_s28 = scalar_lea.vmem %s32_s16, 32  ;;  %p602_p9 = scmp.lt.s32.totalorder %s32_s16, %s32_s16 }
  0x15   :  { %p598_p8 = scmp.ne.s32.totalorder %s32_s16, %s597_s28  ;;  %p603_p10 = scmp.lt.s32.totalorder %s597_s28, %s597_s28 }
  0x17   :  { %p604_p11 = por %p603_p10, %p602_p9 }
  0x19   :  { %p605_p12 = pnand %p604_p11, %p598_p8 }
  0x1b   :  { %608 = shalt.err (!%p605_p12)
}
  0x1c   :  { %s664_s29 = smov [#allocation6]  }
  0x1d   :  { %34 = dma.vmem_to_smem %s32_s16, 32, %s664_s29, [#allocation5]  }
  0x1e   :  { %653 = dma.done.wait [#allocation3], 512  }
  0x1f   :  { %654 = vsyncadd [#allocation3], 4294966784 }
  0x20   :  { %655 = dma.done.wait [#allocation5], 32  }
  0x21   :  { %656 = vsyncadd [#allocation5], 4294967264 }
  0x22   :  { %41 = sfence }
  0x23   :  { %v713_v0 = vld [vmem:[#allocation2] sm:$0xf]  ;;  %v715_v1 = vld [vmem:[#allocation2 + $0x4] sm:$0xf]  ;;  %v717_v2 = vld [vmem:[#allocation2 + $0x8] sm:$0xf] }
  0x24   :  { %v719_v3 = vld [vmem:[#allocation2 + $0xc] sm:$0xf]  ;;  %v721_v4 = vld [vmem:[#allocation2 + $0x10] sm:$0xf]  ;;  %v723_v5 = vld [vmem:[#allocation2 + $0x14] sm:$0xf] }
  0x25   :  { %v725_v6 = vld [vmem:[#allocation2 + $0x18] sm:$0xf]  ;;  %v727_v7 = vld [vmem:[#allocation2 + $0x1c] sm:$0xf]  ;;  %vm50_vm0 = vcmask 1043456   ;;  %vm180_vm1 = vcmask 1041409  }
  0x26   :  { %v51_v8 = vsel %vm50_vm0, %v713_v0, 0.0  ;;  %v58_v9 = vsel %vm50_vm0, %v715_v1, 0.0  ;;  %v65_v10 = vsel %vm50_vm0, %v717_v2, 0.0  ;;  %v72_v11 = vsel %vm50_vm0, %v719_v3, 0.0  ;;  %s665_s0 = smov 3   ;;  %s545_s30 = sld [smem:[#allocation6 + $0x81]] }
  0x27   :  { %v52_v12 = vrot.slane %v51_v8, 4  ;;  %v59_v13 = vrot.slane %v58_v9, 4  ;;  %v66_v14 = vrot.slane %v65_v10, 4  ;;  %v73_v15 = vrot.slane %v72_v11, 4  ;;  %s220_s4 = sld [smem:[#allocation6]]  ;;  %s547_s6 = sld [smem:[#allocation6 + $0x82]] }
  0x28   :  { %v79_v16 = vsel %vm50_vm0, %v721_v4, 0.0  ;;  %v86_v17 = vsel %vm50_vm0, %v723_v5, 0.0  ;;  %v93_v18 = vsel %vm50_vm0, %v725_v6, 0.0  ;;  %v100_v19 = vsel %vm50_vm0, %v727_v7, 0.0  ;;  %s543_s5 = sld [smem:[#allocation6 + $0x80]]  ;;  %s549_s7 = sld [smem:[#allocation6 + $0x83]] }
  0x29   :  { %v53_v20 = vadd.f32 %v52_v12, %v51_v8  ;;  %v60_v21 = vadd.f32 %v59_v13, %v58_v9  ;;  %v67_v22 = vadd.f32 %v66_v14, %v65_v10  ;;  %v74_v23 = vadd.f32 %v73_v15, %v72_v11  ;;  %s551_s8 = sld [smem:[#allocation6 + $0x84]]  ;;  %s666_s9 = smov 127  }
  0x2a   :  { %v80_v24 = vrot.slane %v79_v16, 4  ;;  %v87_v25 = vrot.slane %v86_v17, 4  ;;  %v94_v26 = vrot.slane %v93_v18, 4  ;;  %v101_v27 = vrot.slane %v100_v19, 4  ;;  %s553_s10 = sld [smem:[#allocation6 + $0x85]]  ;;  %s667_s11 = smov 126  }
  0x2b   :  { %v54_v28 = vrot.slane %v53_v20, 2  ;;  %v61_v29 = vrot.slane %v60_v21, 2  ;;  %v68_v30 = vrot.slane %v67_v22, 2  ;;  %v75_v31 = vrot.slane %v74_v23, 2  ;;  %s544_s12 = sld [smem:[#allocation6 + $0x1]]  ;;  %s800_s13 = sld [smem:[#allocation6 + $0x2]] }
  0x2c   :  { %v81_v32 = vadd.f32 %v80_v24, %v79_v16  ;;  %v88_v33 = vadd.f32 %v87_v25, %v86_v17  ;;  %v95_v34 = vadd.f32 %v94_v26, %v93_v18  ;;  %v102_v35 = vadd.f32 %v101_v27, %v100_v19  ;;  %s668_s14 = smov 125   ;;  %s806_s15 = sld [smem:[#allocation6 + $0x3]] }
  0x2d   :  { %v55_v36 = vadd.f32 %v54_v28, %v53_v20  ;;  %v62_v37 = vadd.f32 %v61_v29, %v60_v21  ;;  %v69_v38 = vadd.f32 %v68_v30, %v67_v22  ;;  %v76_v39 = vadd.f32 %v75_v31, %v74_v23  ;;  %s669_s16 = smov 124   ;;  %s550_s17 = sld [smem:[#allocation6 + $0x4]] }
  0x2e   :  { %v82_v40 = vrot.slane %v81_v32, 2  ;;  %v89_v41 = vrot.slane %v88_v33, 2  ;;  %v96_v42 = vrot.slane %v95_v34, 2  ;;  %v103_v43 = vrot.slane %v102_v35, 2  ;;  %s670_s18 = smov 123   ;;  %s552_s19 = sld [smem:[#allocation6 + $0x5]] }
  0x2f   :  { %v56_v44 = vrot.slane %v55_v36, 1  ;;  %v63_v45 = vrot.slane %v62_v37, 1  ;;  %v70_v46 = vrot.slane %v69_v38, 1  ;;  %v77_v47 = vrot.slane %v76_v39, 1  ;;  %s554_s20 = sld [smem:[#allocation6 + $0x6]]  ;;  %s671_s22 = smov 122  }
  0x30   :  { %v83_v48 = vadd.f32 %v82_v40, %v81_v32  ;;  %v90_v49 = vadd.f32 %v89_v41, %v88_v33  ;;  %v97_v50 = vadd.f32 %v96_v42, %v95_v34  ;;  %v104_v51 = vadd.f32 %v103_v43, %v102_v35  ;;  %s555_s21 = sld [smem:[#allocation6 + $0x86]]  ;;  %s673_s23 = smov [#allocation8]  }
  0x31   :  { %v57_v52 = vadd.f32 %v56_v44, %v55_v36  ;;  %v64_v53 = vadd.f32 %v63_v45, %v62_v37  ;;  %v71_v54 = vadd.f32 %v70_v46, %v69_v38  ;;  %v78_v55 = vadd.f32 %v77_v47, %v76_v39  ;;  %s529_s24 = sshll.u32 %s673_s23, 4  ;;  %s530_s24 = int_to_ptr.vmem [resolvable:$true] %s529_s24 }
  0x32   :  { %v84_v56 = vrot.slane %v83_v48, 1  ;;  %v91_v57 = vrot.slane %v90_v49, 1  ;;  %v98_v58 = vrot.slane %v97_v50, 1  ;;  %v105_v59 = vrot.slane %v104_v51, 1  ;;  %s609_s26 = scalar_lea.vmem %s530_s24, 128  ;;  %p614_p0 = scmp.lt.s32.totalorder %s530_s24, %s530_s24 }
  0x33   :  { %v108_v60 = vmul.f32 0.25, %v57_v52  ;;  %v109_v61 = vmul.f32 0.25, %v64_v53  ;;  %v110_v62 = vmul.f32 0.25, %v71_v54  ;;  %v111_v63 = vmul.f32 0.25, %v78_v55  ;;  %p610_p13 = scmp.ne.s32.totalorder %s530_s24, %s609_s26  ;;  %p615_p1 = scmp.lt.s32.totalorder %s609_s26, %s609_s26 }
  0x34   :  { %v85_v8 = vadd.f32 %v84_v56, %v83_v48  ;;  %v92_v9 = vadd.f32 %v91_v57, %v90_v49  ;;  %v99_v10 = vadd.f32 %v98_v58, %v97_v50  ;;  %v106_v11 = vadd.f32 %v105_v59, %v104_v51 }
  0x35   :  { %v181_v12 = vsel %vm180_vm1, %v109_v61, %v108_v60  ;;  %vm182_vm2 = vcmask 1042434   ;;  %vm184_vm3 = vcmask 1043459   ;;  %vm186_vm4 = vcmask 1044484   ;;  %p616_p2 = por %p615_p1, %p614_p0 }
  0x36   :  { %v112_v13 = vmul.f32 0.25, %v85_v8  ;;  %v113_v14 = vmul.f32 0.25, %v92_v9  ;;  %v114_v15 = vmul.f32 0.25, %v99_v10  ;;  %v115_v16 = vmul.f32 0.25, %v106_v11 }
  0x37   :  { %v183_v17 = vsel %vm182_vm2, %v110_v62, %v181_v12  ;;  %vm188_vm5 = vcmask 1045509   ;;  %vm190_vm6 = vcmask 1046534   ;;  %vm192_vm7 = vcmask 1047559   ;;  %p617_p3 = pnand %p616_p2, %p610_p13 }
  0x38   :  { %v185_v18 = vsel %vm184_vm3, %v111_v63, %v183_v17  ;;  %v116_v19 = vsel %vm50_vm0, %v713_v0, -inf  ;;  %v123_v20 = vsel %vm50_vm0, %v715_v1, -inf  ;;  %v130_v21 = vsel %vm50_vm0, %v717_v2, -inf }
  0x39   :  { %v187_v22 = vsel %vm186_vm4, %v112_v13, %v185_v18  ;;  %v117_v23 = vrot.slane %v116_v19, 4  ;;  %v124_v24 = vrot.slane %v123_v20, 4  ;;  %v131_v25 = vrot.slane %v130_v21, 4 }
  0x3a   :  { %v189_v26 = vsel %vm188_vm5, %v113_v14, %v187_v22  ;;  %v137_v27 = vsel %vm50_vm0, %v719_v3, -inf  ;;  %v144_v28 = vsel %vm50_vm0, %v721_v4, -inf  ;;  %v151_v0 = vsel %vm50_vm0, %v723_v5, -inf }
  0x3b   :  { %v191_v1 = vsel %vm190_vm6, %v114_v15, %v189_v26  ;;  %v118_v29 = vmax.f32 %v116_v19, %v117_v23  ;;  %v125_v2 = vmax.f32 %v123_v20, %v124_v24  ;;  %v132_v30 = vmax.f32 %v130_v21, %v131_v25 }
  0x3c   :  { %v193_v31 = vsel %vm192_vm7, %v115_v16, %v191_v1  ;;  %v138_v32 = vrot.slane %v137_v27, 4  ;;  %v145_v33 = vrot.slane %v144_v28, 4  ;;  %v152_v34 = vrot.slane %v151_v0, 4 }
  0x3d   :  { %194 = vrot.lane.b32.xlu0 %v193_v31, %s665_s0  ;;  %v119_v3 = vrot.slane %v118_v29, 2  ;;  %v126_v35 = vrot.slane %v125_v2, 2  ;;  %v133_v36 = vrot.slane %v132_v30, 2  ;;  %v158_v4 = vsel %vm50_vm0, %v725_v6, -inf }
  0x3e   :  { %v139_v5 = vmax.f32 %v137_v27, %v138_v32  ;;  %v146_v37 = vmax.f32 %v144_v28, %v145_v33  ;;  %v153_v38 = vmax.f32 %v151_v0, %v152_v34  ;;  %v159_v39 = vrot.slane %v158_v4, 4 }
  0x3f   :  { %v120_v40 = vmax.f32 %v118_v29, %v119_v3  ;;  %v127_v41 = vmax.f32 %v125_v2, %v126_v35  ;;  %v134_v42 = vmax.f32 %v132_v30, %v133_v36  ;;  %v165_v43 = vsel %vm50_vm0, %v727_v7, -inf }
  0x40   :  { %v140_v44 = vrot.slane %v139_v5, 2  ;;  %v147_v45 = vrot.slane %v146_v37, 2  ;;  %v154_v46 = vrot.slane %v153_v38, 2  ;;  %v160_v47 = vmax.f32 %v158_v4, %v159_v39 }
  0x41   :  { %v121_v48 = vrot.slane %v120_v40, 1  ;;  %v128_v49 = vrot.slane %v127_v41, 1  ;;  %v135_v50 = vrot.slane %v134_v42, 1  ;;  %v166_v51 = vrot.slane %v165_v43, 4 }
  0x42   :  { %v141_v52 = vmax.f32 %v139_v5, %v140_v44  ;;  %v148_v6 = vmax.f32 %v146_v37, %v147_v45  ;;  %v155_v53 = vmax.f32 %v153_v38, %v154_v46  ;;  %v161_v54 = vrot.slane %v160_v47, 2 }
  0x43   :  { %v122_v55 = vmax.f32 %v120_v40, %v121_v48  ;;  %v129_v56 = vmax.f32 %v127_v41, %v128_v49  ;;  %v136_v57 = vmax.f32 %v134_v42, %v135_v50  ;;  %v167_v58 = vmax.f32 %v165_v43, %v166_v51 }
  0x44   :  { %v142_v59 = vrot.slane %v141_v52, 1  ;;  %v149_v60 = vrot.slane %v148_v6, 1  ;;  %v156_v61 = vrot.slane %v155_v53, 1  ;;  %v162_v7 = vmax.f32 %v160_v47, %v161_v54 }
  0x45   :  { %v168_v62 = vrot.slane %v167_v58, 2  ;;  %v208_v63 = vsel %vm180_vm1, %v129_v56, %v122_v55  ;;  %vm197_vm8 = vcmask 23552   ;;  %v243_v23 = vstv %s545_s30 }
  0x46   :  { %v143_v8 = vmax.f32 %v141_v52, %v142_v59  ;;  %v150_v9 = vmax.f32 %v148_v6, %v149_v60  ;;  %v157_v10 = vmax.f32 %v155_v53, %v156_v61  ;;  %v163_v11 = vrot.slane %v162_v7, 1 }
  0x47   :  { %v169_v12 = vmax.f32 %v167_v58, %v168_v62  ;;  %v209_v13 = vsel %vm182_vm2, %v136_v57, %v208_v63  ;;  %v222_v27 = vstv %s220_s4  ;;  %v225_v29 = vstv %s543_s5 }
  0x48   :  { %v164_v14 = vmax.f32 %v162_v7, %v163_v11  ;;  %v210_v15 = vsel %vm184_vm3, %v143_v8, %v209_v13  ;;  %v270_v2 = vstv %s547_s6  ;;  %v297_v34 = vstv %s549_s7 }
  0x49   :  { %v170_v16 = vrot.slane %v169_v12, 1  ;;  %v211_v17 = vsel %vm186_vm4, %v150_v9, %v210_v15  ;;  %v324_v4 = vstv %s551_s8  ;;  %v351_v38 = vstv %s553_s10 }
  0x4a   :  { %v212_v18 = vsel %vm188_vm5, %v157_v10, %v211_v17  ;;  %v230_v41 = vstv %s544_s12  ;;  %v257_v42 = vstv %s800_s13  ;;  %v284_v46 = vstv %s806_s15 }
  0x4b   :  { %v171_v19 = vmax.f32 %v169_v12, %v170_v16  ;;  %v213_v20 = vsel %vm190_vm6, %v164_v14, %v212_v18  ;;  %v311_v49 = vstv %s550_s17  ;;  %v338_v52 = vstv %s552_s19 }
  0x4c   :  { %v365_v54 = vstv %s554_s20  ;;  %v378_v57 = vstv %s555_s21  ;;  %vm239_vm9 = vcmask 1039360   ;;  %vm266_vm10 = vcmask 1031168  }
  0x4d   :  { %v214_v21 = vsel %vm192_vm7, %v171_v19, %v213_v20  ;;  %vm293_vm11 = vcmask 1022976   ;;  %vm320_vm12 = vcmask 1014784   ;;  %vm347_vm13 = vcmask 1006592  }
  0x4e   :  { %215 = vrot.lane.b32.xlu0 %v214_v21, %s665_s0  ;;  %vm374_vm14 = vcmask 998400  }
  0xaf   :  { %v195_v22 = vpop.permute.xlu0 %194 }
  0xb0   :  { %v784_v28 = vsel %vm197_vm8, 0.0, %v195_v22  ;;  %v199_v45 = vsel %vm197_vm8, %v195_v22, 0.0 }
  0xb1   :  { %v223_v30 = vmul.f32 %v222_v27, %v784_v28  ;;  %v231_v43 = vmul.f32 %v230_v41, %v784_v28  ;;  %v258_v44 = vmul.f32 %v257_v42, %v784_v28  ;;  %v232_v47 = vmul.f32 %v230_v41, %v199_v45 }
  0xb2   :  { %v285_v48 = vmul.f32 %v284_v46, %v784_v28  ;;  %v259_v50 = vmul.f32 %v257_v42, %v199_v45  ;;  %v312_v51 = vmul.f32 %v311_v49, %v784_v28  ;;  %v286_v6 = vmul.f32 %v284_v46, %v199_v45 }
  0xb3   :  { %v339_v53 = vmul.f32 %v338_v52, %v784_v28  ;;  %v313_v55 = vmul.f32 %v311_v49, %v199_v45  ;;  %v366_v56 = vmul.f32 %v365_v54, %v784_v28  ;;  %v340_v58 = vmul.f32 %v338_v52, %v199_v45 }
  0xb4   :  { %v367_v60 = vmul.f32 %v365_v54, %v199_v45  ;;  %v402_v52 = vlaneseq }
  0xc0   :  { %v216_v24 = vpop.permute.xlu0 %215 }
  0xc1   :  { %v778_v25 = vsel %vm197_vm8, 0.0, %v216_v24  ;;  %v781_v26 = vsel %vm197_vm8, %v216_v24, 0.0 }
  0xc2   :  { %v245_v0 = vmul.f32 %v243_v23, %v781_v26  ;;  %v244_v1 = vmul.f32 %v243_v23, %v778_v25  ;;  %v226_v31 = vmul.f32 %v225_v29, %v778_v25  ;;  %v272_v32 = vmul.f32 %v270_v2, %v781_v26 }
  0xc3   :  { %v271_v33 = vmul.f32 %v270_v2, %v778_v25  ;;  %v299_v35 = vmul.f32 %v297_v34, %v781_v26  ;;  %v298_v36 = vmul.f32 %v297_v34, %v778_v25  ;;  %v326_v5 = vmul.f32 %v324_v4, %v781_v26 }
  0xc4   :  { %250 = vrot.lane.b32.xlu1 %v245_v0, %s666_s9  ;;  %248 = vrot.lane.b32.xlu0 %v244_v1, %s666_s9  ;;  %v794_v3 = vadd.f32 %v226_v31, %v223_v30  ;;  %v325_v37 = vmul.f32 %v324_v4, %v778_v25  ;;  %v353_v39 = vmul.f32 %v351_v38, %v781_v26 }
  0xc5   :  { %v352_v40 = vmul.f32 %v351_v38, %v778_v25  ;;  %v379_v59 = vmul.f32 %v378_v57, %v778_v25  ;;  %v380_v61 = vmul.f32 %v378_v57, %v781_v26 }
  0xc8   :  { %277 = vrot.lane.b32.xlu1 %v272_v32, %s667_s11  ;;  %275 = vrot.lane.b32.xlu0 %v271_v33, %s667_s11 }
  0xcc   :  { %304 = vrot.lane.b32.xlu1 %v299_v35, %s668_s14  ;;  %302 = vrot.lane.b32.xlu0 %v298_v36, %s668_s14 }
  0xd0   :  { %331 = vrot.lane.b32.xlu1 %v326_v5, %s669_s16  ;;  %329 = vrot.lane.b32.xlu0 %v325_v37, %s669_s16 }
  0xd4   :  { %358 = vrot.lane.b32.xlu1 %v353_v39, %s670_s18  ;;  %356 = vrot.lane.b32.xlu0 %v352_v40, %s670_s18 }
  0xd8   :  { %235 = vrot.lane.b32.xlu1 %v231_v43, %s666_s9  ;;  %262 = vrot.lane.b32.xlu0 %v258_v44, %s667_s11 }
  0xdc   :  { %237 = vrot.lane.b32.xlu1 %v232_v47, %s666_s9  ;;  %289 = vrot.lane.b32.xlu0 %v285_v48, %s668_s14 }
  0xe0   :  { %264 = vrot.lane.b32.xlu1 %v259_v50, %s667_s11  ;;  %316 = vrot.lane.b32.xlu0 %v312_v51, %s669_s16  ;;  %v672_v50 = vmov 1966171168  }
  0xe1   :  { %v400_v51 = vunpack.c.l.s4 %v672_v50 }
  0xe4   :  { %291 = vrot.lane.b32.xlu1 %v286_v6, %s668_s14  ;;  %343 = vrot.lane.b32.xlu0 %v339_v53, %s670_s18  ;;  %v401_v6 = vunpack.c.0.s8 %v400_v51  ;;  %v403_v53 = vshrl.u32 %v402_v52, 7 }
  0xe6   :  { %v404_v54 = vsub.s32 %v401_v6, %v403_v53 }
  0xe8   :  { %318 = vrot.lane.b32.xlu1 %v313_v55, %s669_s16  ;;  %370 = vrot.lane.b32.xlu0 %v366_v56, %s671_s22 }
  0xec   :  { %345 = vrot.lane.b32.xlu1 %v340_v58, %s670_s18  ;;  %383 = vrot.lane.b32.xlu0 %v379_v59, %s671_s22  ;;  %v457_v58 = vsub.s32 0, %v403_v53 }
  0xf0   :  { %372 = vrot.lane.b32.xlu1 %v367_v60, %s671_s22 }
  0xf4   :  { %385 = vrot.lane.b32.xlu1 %v380_v61, %s671_s22 }
 0x136   :  { %v251_v7 = vpop.permute.xlu1 %250  ;;  %v249_v62 = vpop.permute.xlu0 %248 }
 0x137   :  { %v252_v21 = vsel %vm239_vm9, %v249_v62, %v251_v7 }
 0x13a   :  { %v278_v63 = vpop.permute.xlu1 %277  ;;  %v276_v8 = vpop.permute.xlu0 %275 }
 0x13b   :  { %v279_v27 = vsel %vm266_vm10, %v276_v8, %v278_v63 }
 0x13e   :  { %v305_v9 = vpop.permute.xlu1 %304  ;;  %v303_v10 = vpop.permute.xlu0 %302 }
 0x13f   :  { %v306_v2 = vsel %vm293_vm11, %v303_v10, %v305_v9 }
 0x142   :  { %v332_v11 = vpop.permute.xlu1 %331  ;;  %v330_v12 = vpop.permute.xlu0 %329 }
 0x146   :  { %v359_v13 = vpop.permute.xlu1 %358  ;;  %v357_v14 = vpop.permute.xlu0 %356 }
 0x147   :  { %v360_v38 = vsel %vm347_vm13, %v357_v14, %v359_v13 }
 0x14a   :  { %v236_v15 = vpop.permute.xlu1 %235  ;;  %v263_v16 = vpop.permute.xlu0 %262 }
 0x14e   :  { %v238_v17 = vpop.permute.xlu1 %237  ;;  %v290_v18 = vpop.permute.xlu0 %289 }
 0x14f   :  { %v240_v19 = vsel %vm239_vm9, %v236_v15, %v238_v17 }
 0x150   :  { %v242_v20 = vadd.f32 %v240_v19, %v794_v3  ;;  %v333_v3 = vsel %vm320_vm12, %v330_v12, %v332_v11 }
 0x152   :  { %v265_v22 = vpop.permute.xlu1 %264  ;;  %v254_v23 = vadd.f32 %v252_v21, %v242_v20  ;;  %v317_v26 = vpop.permute.xlu0 %316 }
 0x153   :  { %v267_v24 = vsel %vm266_vm10, %v263_v16, %v265_v22 }
 0x154   :  { %v269_v25 = vadd.f32 %v267_v24, %v254_v23 }
 0x156   :  { %v292_v28 = vpop.permute.xlu1 %291  ;;  %v281_v0 = vadd.f32 %v279_v27, %v269_v25  ;;  %v344_v30 = vpop.permute.xlu0 %343 }
 0x157   :  { %v294_v1 = vsel %vm293_vm11, %v290_v18, %v292_v28 }
 0x158   :  { %v296_v29 = vadd.f32 %v294_v1, %v281_v0 }
 0x15a   :  { %v319_v31 = vpop.permute.xlu1 %318  ;;  %v308_v32 = vadd.f32 %v306_v2, %v296_v29  ;;  %v371_v5 = vpop.permute.xlu0 %370 }
 0x15b   :  { %v321_v33 = vsel %vm320_vm12, %v317_v26, %v319_v31 }
 0x15c   :  { %v323_v34 = vadd.f32 %v321_v33, %v308_v32 }
 0x15e   :  { %v346_v35 = vpop.permute.xlu1 %345  ;;  %v335_v36 = vadd.f32 %v333_v3, %v323_v34  ;;  %v384_v42 = vpop.permute.xlu0 %383 }
 0x15f   :  { %v348_v4 = vsel %vm347_vm13, %v344_v30, %v346_v35 }
 0x160   :  { %v350_v37 = vadd.f32 %v348_v4, %v335_v36 }
 0x162   :  { %v373_v39 = vpop.permute.xlu1 %372  ;;  %v362_v40 = vadd.f32 %v360_v38, %v350_v37 }
 0x163   :  { %v375_v41 = vsel %vm374_vm14, %v371_v5, %v373_v39 }
 0x164   :  { %v377_v43 = vadd.f32 %v375_v41, %v362_v40 }
 0x166   :  { %v386_v44 = vpop.permute.xlu1 %385 }
 0x167   :  { %v387_v45 = vsel %vm374_vm14, %v384_v42, %v386_v44 }
 0x168   :  { %v389_v46 = vadd.f32 %v387_v45, %v377_v43 }
 0x16a   :  { %v556_v47 = vmul.f32 -1.442695, %v389_v46 }
 0x16c   :  { %571 = vpow2.f32 %v556_v47 }
 0x176   :  { %v572_v48 = vpop.eup %571 }
 0x177   :  { %v393_v49 = vadd.f32 1.0, %v572_v48 }
 0x179   :  { %573 = vrcp.f32 %v393_v49 }
 0x183   :  { %v574_v55 = vpop.eup %573 }
 0x184   :  { %396 = vst [vmem:[#allocation8] sm:$0xff] %v574_v55  ;;  %v398_v56 = vcombine.high %v574_v55, %v574_v55  ;;  %v405_v57 = vrot.slane %v574_v55, %v404_v54 }
 0x185   :  { %620 = shalt.err (!%p617_p3)
}
 0x186   :  { %s621_s29 = scalar_lea.hbm %s866_s3, 128 }
 0x187   :  { %p622_p4 = scmp.ne.s32.totalorder %s866_s3, %s621_s29  ;;  %p625_p5 = scmp.lt.u32.totalorder %s621_s29, %s866_s3 }
 0x189   :  { %p627_p6 = pnand %p625_p5, %p622_p4 }
 0x18b   :  { %630 = shalt.err (!%p627_p6)
}
 0x18c   :  { %532 = dma.vmem_to_hbm [thread:$0]  %s530_s24, 128, %s866_s3, [#allocation9]   ;;  %v412_v59 = vrot.slane %v398_v56, %v404_v54  ;;  %v413_v60 = vcombine.high %v405_v57, %v405_v57  ;;  %v421_v61 = vrot.slane %v405_v57, %v404_v54  ;;  %v447_v9 = vld [vmem:[#allocation2] sm:$0xf]  ;;  %v448_v10 = vld [vmem:[#allocation2 + $0x4] sm:$0xf] }
 0x18d   :  { %v449_v15 = vld [vmem:[#allocation2 + $0x8] sm:$0xf]  ;;  %v451_v16 = vld [vmem:[#allocation2 + $0x10] sm:$0xf]  ;;  %v450_v18 = vld [vmem:[#allocation2 + $0xc] sm:$0xf] }
 0x18e   :  { %v414_v7 = vcombine.high %v412_v59, %v412_v59  ;;  %v428_v62 = vrot.slane %v412_v59, %v404_v54  ;;  %v435_v63 = vrot.slane %v413_v60, %v404_v54  ;;  %v443_v8 = vcombine.high %v421_v61, %v421_v61  ;;  %v452_v19 = vld [vmem:[#allocation2 + $0x14] sm:$0xf]  ;;  %v453_v20 = vld [vmem:[#allocation2 + $0x18] sm:$0xf]  ;;  %v454_v28 = vld [vmem:[#allocation2 + $0x1c] sm:$0xf] }
 0x18f   :  { %v458_v11 = vrot.slane %v421_v61, %v457_v58  ;;  %s674_s3 = smov [#allocation7]  }
 0x190   :  { %v442_v12 = vrot.slane %v414_v7, %v404_v54  ;;  %v444_v13 = vcombine.high %v428_v62, %v428_v62  ;;  %v445_v14 = vcombine.high %v435_v63, %v435_v63  ;;  %v462_v17 = vrot.slane %v435_v63, %v457_v58  ;;  %s516_s8 = sshll.u32 %s674_s3, 4  ;;  %s517_s8 = int_to_ptr.vmem [resolvable:$true] %s516_s8 }
 0x191   :  { %v466_v21 = vrot.slane %v443_v8, %v457_v58  ;;  %v474_v22 = vrot.slane %v428_v62, %v457_v58  ;;  %v495_v23 = vmul.f32 %v458_v11, %v447_v9  ;;  %s631_s9 = scalar_lea.vmem %s517_s8, 512  ;;  %p636_p8 = scmp.lt.s32.totalorder %s517_s8, %s517_s8 }
 0x192   :  { %v446_v24 = vcombine.high %v442_v12, %v442_v12  ;;  %v470_v25 = vrot.slane %v445_v14, %v457_v58  ;;  %v478_v26 = vrot.slane %v442_v12, %v457_v58  ;;  %v482_v27 = vrot.slane %v444_v13, %v457_v58  ;;  %p632_p7 = scmp.ne.s32.totalorder %s517_s8, %s631_s9  ;;  %p637_p9 = scmp.lt.s32.totalorder %s631_s9, %s631_s9 }
 0x193   :  { %v496_v0 = vmul.f32 %v462_v17, %v448_v10  ;;  %v497_v1 = vmul.f32 %v466_v21, %v449_v15  ;;  %v499_v29 = vmul.f32 %v474_v22, %v451_v16  ;;  %503 = vst [vmem:[#allocation7] sm:$0xf] %v495_v23 }
 0x194   :  { %v486_v2 = vrot.slane %v446_v24, %v457_v58  ;;  %v498_v30 = vmul.f32 %v470_v25, %v450_v18  ;;  %v500_v31 = vmul.f32 %v478_v26, %v452_v19  ;;  %v501_v32 = vmul.f32 %v482_v27, %v453_v20  ;;  %p638_p10 = por %p637_p9, %p636_p8 }
 0x195   :  { %504 = vst [vmem:[#allocation7 + $0x4] sm:$0xf] %v496_v0  ;;  %505 = vst [vmem:[#allocation7 + $0x8] sm:$0xf] %v497_v1 }
 0x196   :  { %507 = vst [vmem:[#allocation7 + $0x10] sm:$0xf] %v499_v29  ;;  %v502_v33 = vmul.f32 %v486_v2, %v454_v28  ;;  %506 = vst [vmem:[#allocation7 + $0xc] sm:$0xf] %v498_v30  ;;  %p639_p11 = pnand %p638_p10, %p632_p7 }
 0x197   :  { %508 = vst [vmem:[#allocation7 + $0x14] sm:$0xf] %v500_v31  ;;  %509 = vst [vmem:[#allocation7 + $0x18] sm:$0xf] %v501_v32 }
 0x198   :  { %510 = vst [vmem:[#allocation7 + $0x1c] sm:$0xf] %v502_v33 }
 0x199   :  { %642 = shalt.err (!%p639_p11)
}
 0x19a   :  { %s643_s12 = scalar_lea.hbm %s865_s2, 512 }
 0x19b   :  { %p644_p12 = scmp.ne.s32.totalorder %s865_s2, %s643_s12  ;;  %p647_p13 = scmp.lt.u32.totalorder %s643_s12, %s865_s2 }
 0x19d   :  { %p649_p0 = pnand %p647_p13, %p644_p12 }
 0x19f   :  { %652 = shalt.err (!%p649_p0)
}
 0x1a0   :  { %522 = dma.vmem_to_hbm [thread:$0]  %s517_s8, 512, %s865_s2, [#allocation4], %s662_s1, %s662_s1, %s663_s25  }
 0x1a1   :  { %657 = dma.done.wait [#allocation4], 512  }
 0x1a2   :  { %658 = vsyncadd [#allocation4], 4294966784 }
 0x1a3   :  { %659 = dma.done.wait [#allocation9], 128  }
 0x1a4   :  { %660 = vsyncadd [#allocation9], 4294967168 }
 0x1a5   :  { %539 = vsyncpa [#allocation3], 1 }
 0x1a6   :  { %540 = vsyncpa [#allocation4], 1 }
 0x1a7   :  { %541 = vsyncpa [#allocation9], 1 }
 0x1a8   :  { %542 = vsyncpa [#allocation5], 1 }

</bundles_post_ra>
